<compile_context>
chip_gen: v5e
topology: v5e:2x2
jax: 0.10.0
libtpu: 0.0.40
codegen_flags: <defaults>
</compile_context>

<pallas_src>
import math

import jax
import jax.numpy as jnp
from jax import lax
from jax.experimental import pallas as pl
from jax.experimental.pallas import tpu as pltpu


_EPS = 1e-12  # torch.nn.functional.normalize default eps


def _round_up(x, n):
    return ((x + n - 1) // n) * n


def _bytes(dt):
    return jnp.dtype(dt).itemsize


def _vmem_limit(need_bytes, floor=16 << 20, cap=64 << 20):
    # Working set * 1.5 + 2 MiB headroom, clamped so we never over-reserve
    # v7x's 64 MiB physical VMEM (harmless slack on v5e/v6e's 128 MiB).
    return int(min(max(int(need_bytes * 1.5) + (2 << 20), floor), cap))


def _default_block_b():
    # v6e / v7x MXUs are 256 wide -> M=256 fills them; v5e's 4x128x128 MXU is
    # already full at 128 and is the most HBM-bound generation, keep 128 there.
    try:
        kind = jax.devices()[0].device_kind.lower()
    except Exception:
        return 128
    return 128 if "v5" in kind else 256


# ---------------------------------------------------------------------------
# Prep kernel 1: row-L2-normalize a (N, D) matrix, cast to the matmul dtype.
# Used for x (one-shot, so the main kernel never re-normalizes x per class
# tile and its x block is half the bytes).
# ---------------------------------------------------------------------------
def _row_normalize_kernel(x_ref, out_ref):
    x = x_ref[...].astype(jnp.float32)
    inv = lax.rsqrt(jnp.maximum(jnp.sum(x * x, axis=-1, keepdims=True),
                                _EPS * _EPS))
    out_ref[...] = (x * inv).astype(out_ref.dtype)


def _normalize_rows(x, out_dtype, max_bytes=24 << 20):
    N, D = x.shape
    per_row = 2 * D * (_bytes(x.dtype) + _bytes(out_dtype))  # double-buffered
    tile = max(8, min(512, (max_bytes // max(per_row, 1)) // 8 * 8))
    tile = min(tile, _round_up(N, 8))
    need = tile * per_row
    return pl.pallas_call(
        _row_normalize_kernel,
        out_shape=jax.ShapeDtypeStruct((N, D), out_dtype),
        grid_spec=pltpu.PrefetchScalarGridSpec(
            num_scalar_prefetch=0,
            grid=(pl.cdiv(N, tile),),
            in_specs=[pl.BlockSpec((tile, D), lambda i: (i, 0))],
            out_specs=pl.BlockSpec((tile, D), lambda i: (i, 0)),
        ),
        compiler_params=pltpu.CompilerParams(
            dimension_semantics=("parallel",),
            vmem_limit_bytes=_vmem_limit(need),
        ),
    )(x)


# ---------------------------------------------------------------------------
# Prep kernel 2: row-L2-normalize the (C, D) weight, cast, emit transposed as
# (D, C).  Its class tile is independent of the main kernel's tile_c so the
# (tc, D) f32 block stays small even for large D (v7x VMEM budget).
# ---------------------------------------------------------------------------
def _normalize_transpose_kernel(w_ref, out_ref):
    w = w_ref[...].astype(jnp.float32)                              # (tc, D)
    inv = lax.rsqrt(jnp.maximum(jnp.sum(w * w, axis=-1, keepdims=True),
                                _EPS * _EPS))
    out_ref[...] = (w * inv).T.astype(out_ref.dtype)                # (D, tc)


def _prep_weight(weight, out_dtype, max_bytes=24 << 20):
    C, D = weight.shape
    per_row = 2 * D * (_bytes(weight.dtype) + _bytes(out_dtype))
    tc = max(128, min(512, (max_bytes // max(per_row, 1)) // 128 * 128))
    if C <= tc:
        tc = C                      # single full-extent block (any C allowed)
    need = tc * per_row
    return pl.pallas_call(
        _normalize_transpose_kernel,
        out_shape=jax.ShapeDtypeStruct((D, C), out_dtype),
        grid_spec=pltpu.PrefetchScalarGridSpec(
            num_scalar_prefetch=0,
            grid=(pl.cdiv(C, tc),),
            in_specs=[pl.BlockSpec((tc, D), lambda j: (j, 0))],
            out_specs=pl.BlockSpec((D, tc), lambda j: (0, j)),
        ),
        compiler_params=pltpu.CompilerParams(
            dimension_semantics=("parallel",),
            vmem_limit_bytes=_vmem_limit(need),
        ),
    )(weight)


# ---------------------------------------------------------------------------
# Main kernels: cosine matmul (+ ArcFace margin) on a (block_b, tile_c) tile.
# Grid is (class_tile, batch_tile): class axis outermost -> weight resident.
# ---------------------------------------------------------------------------
def _make_margin_kernel(s, cos_m, sin_m, th, mm, easy_margin, tile_c,
                        with_cosine):
    def kernel(label_ref, xn_ref, wt_ref, out_ref, *cos_ref):
        j = pl.program_id(0)                                        # class tile

        # cosine on the MXU: pre-normalized operands, f32 accumulation.
        cosine = jnp.dot(xn_ref[...], wt_ref[...],
                         preferred_element_type=jnp.float32)        # (bb, tc)

        # One-hot compare against the *global* class id (offset j*tile_c).
        label = label_ref[...]                                      # (bb, 1)
        class_ids = j * tile_c + lax.broadcasted_iota(
            jnp.int32, cosine.shape, 1)
        is_target = class_ids == label                              # (bb, tc)

        # Margin math only for the label column: masked lane-reduce gather,
        # then per-row sqrt / where instead of full-tile work.
        target_cos = jnp.sum(jnp.where(is_target, cosine, 0.0),
                             axis=-1, keepdims=True)                # (bb, 1)
        sine = jnp.sqrt(jnp.clip(1.0 - target_cos * target_cos, 0.0, 1.0))
        phi = target_cos * cos_m - sine * sin_m
        if easy_margin:
            phi = jnp.where(target_cos > 0.0, phi, target_cos)
        else:
            phi = jnp.where(target_cos > th, phi, target_cos - mm)

        out_ref[...] = (jnp.where(is_target, phi, cosine) * s).astype(out_ref.dtype)
        if with_cosine:
            cos_ref[0][...] = cosine.astype(cos_ref[0].dtype)

    return kernel


def _make_plain_kernel(s):
    # use_penalty=False specialization: no label, no iota/compare/margin math.
    def kernel(xn_ref, wt_ref, out_ref):
        cosine = jnp.dot(xn_ref[...], wt_ref[...],
                         preferred_element_type=jnp.float32)
        out_ref[...] = (cosine * s).astype(out_ref.dtype)
    return kernel


def arc_margin_product(x, weight, label=None, *, s=30.0, m=0.3,
                       easy_margin=False, use_penalty=True, return_cosine=True,
                       block_b=None, tile_c=2048,
                       matmul_dtype=jnp.bfloat16,
                       output_dtype=jnp.float32,
                       cosine_dtype=jnp.bfloat16):
    """Pallas implementation of ArcMarginProduct.forward.

    x:      (B, D) float32
    weight: (C, D) float32  (torch layout: out_features x in_features)
    label:  (B,)   int32    (required iff use_penalty)
    returns (output, cosine) if use_penalty (and return_cosine) else s*cosine.
    """
    B, D = x.shape
    C, D2 = weight.shape
    assert D == D2
    if label is None:
        assert not use_penalty

    if block_b is None:
        block_b = _default_block_b()

    # Tile clipping: (8, 128) granularity; never bigger than one ragged block.
    block_b = _round_up(max(8, min(block_b, _round_up(B, 8))), 8)
    tile_c = _round_up(max(128, min(tile_c, _round_up(C, 128))), 128)

    with_cosine = bool(use_penalty and return_cosine)
    mat_b = _bytes(matmul_dtype)
    store_b = _bytes(output_dtype) + (_bytes(cosine_dtype) if with_cosine else 0)

    # D-aware tile_c: keep resident weight block + output blocks (double
    # buffered) within ~24 MiB so the whole call fits v7x's 64 MiB VMEM.
    while tile_c > 512 and 2 * tile_c * (D * mat_b + block_b * store_b) > (24 << 20):
        tile_c = _round_up(tile_c // 2, 128)

    n_b = pl.cdiv(B, block_b)
    n_c = pl.cdiv(C, tile_c)

    # One-shot preps: pre-normalized matmul-dtype x and normalized, transposed W.
    xn = _normalize_rows(x.astype(jnp.float32), matmul_dtype)       # (B, D)
    wt = _prep_weight(weight.astype(jnp.float32), matmul_dtype)     # (D, C)

    cos_m = math.cos(m)
    sin_m = math.sin(m)
    th = math.cos(math.pi - m)
    mm = math.sin(math.pi - m) * m

    if use_penalty:
        kernel = _make_margin_kernel(s, cos_m, sin_m, th, mm, easy_margin,
                                     tile_c, with_cosine)
        in_specs = [
            pl.BlockSpec((block_b, 1), lambda j, i: (i, 0)),        # label
            pl.BlockSpec((block_b, D), lambda j, i: (i, 0)),        # norm(x)
            pl.BlockSpec((D, tile_c), lambda j, i: (0, j)),         # norm(W)^T (resident over i)
        ]
        operands = (label.astype(jnp.int32).reshape(B, 1), xn, wt)
        out_shapes = [jax.ShapeDtypeStruct((B, C), output_dtype)]
        out_specs = [pl.BlockSpec((block_b, tile_c), lambda j, i: (i, j))]
        if with_cosine:
            out_shapes.append(jax.ShapeDtypeStruct((B, C), cosine_dtype))
            out_specs.append(pl.BlockSpec((block_b, tile_c), lambda j, i: (i, j)))
    else:
        kernel = _make_plain_kernel(s)
        in_specs = [
            pl.BlockSpec((block_b, D), lambda j, i: (i, 0)),        # norm(x)
            pl.BlockSpec((D, tile_c), lambda j, i: (0, j)),         # norm(W)^T
        ]
        operands = (xn, wt)
        out_shapes = [jax.ShapeDtypeStruct((B, C), output_dtype)]
        out_specs = [pl.BlockSpec((block_b, tile_c), lambda j, i: (i, j))]

    need = (2 * block_b * D * mat_b            # x block (double buffered)
            + 2 * D * tile_c * mat_b           # weight block
            + 2 * block_b * tile_c * store_b   # output block(s)
            + 2 * block_b * 4)                 # label block
    vmem_limit = _vmem_limit(need)

    results = pl.pallas_call(
        kernel,
        out_shape=tuple(out_shapes),
        grid_spec=pltpu.PrefetchScalarGridSpec(
            num_scalar_prefetch=0,
            grid=(n_c, n_b),                   # class tiles OUTERMOST
            in_specs=in_specs,
            out_specs=out_specs,
        ),
        compiler_params=pltpu.CompilerParams(
            dimension_semantics=("parallel", "parallel"),
            vmem_limit_bytes=vmem_limit,
        ),
    )(*operands)

    out = results[0]
    if not use_penalty or not return_cosine:
        return out
    return out, results[1]


# ---------------------------------------------------------------------------
# Host-side helpers + self-test
# ---------------------------------------------------------------------------
def xavier_uniform(key, out_features, in_features):
    # torch.nn.init.xavier_uniform_ gain=1: U(-a, a), a = sqrt(6/(fan_in+fan_out))
    a = math.sqrt(6.0 / (in_features + out_features))
    return jax.random.uniform(key, (out_features, in_features),
                              minval=-a, maxval=a, dtype=jnp.float32)


def _reference(x, weight, label, s, m, easy_margin):
    eps = 1e-12
    xn = x / jnp.maximum(jnp.linalg.norm(x, axis=1, keepdims=True), eps)
    wn = weight / jnp.maximum(jnp.linalg.norm(weight, axis=1, keepdims=True), eps)
    cosine = xn @ wn.T
    sine = jnp.sqrt(jnp.clip(1.0 - cosine ** 2, 0.0, 1.0))
    cos_m, sin_m = math.cos(m), math.sin(m)
    th, mm = math.cos(math.pi - m), math.sin(math.pi - m) * m
    phi = cosine * cos_m - sine * sin_m
    if easy_margin:
        phi = jnp.where(cosine > 0, phi, cosine)
    else:
        phi = jnp.where(cosine > th, phi, cosine - mm)
    one_hot = jax.nn.one_hot(label, cosine.shape[1], dtype=jnp.float32)
    output = (one_hot * phi + (1.0 - one_hot) * cosine) * s
    return output, cosine


if __name__ == "__main__":
    key = jax.random.PRNGKey(0)
    k_x, k_w, k_l = jax.random.split(key, 3)

    # Small shapes; B not a multiple of 8 to exercise ragged batch blocks,
    # C > tile_c in the explicit-tile run to exercise the class grid axis.
    B, D, C = 10, 32, 384
    s, m = 30.0, 0.3

    x = jax.random.normal(k_x, (B, D), dtype=jnp.float32)
    weight = xavier_uniform(k_w, C, D)
    label = jax.random.randint(k_l, (B,), 0, C, dtype=jnp.int32)

    ref_out, ref_cos = _reference(x, weight, label, s, m, easy_margin=False)

    # --- f32-matmul / f32-cosine path, small tiles -> 3x2 grid (tight-ish
    #     check; tolerance covers EUP rsqrt vs the reference's sqrt+divide).
    out32, cos32 = arc_margin_product(
        x, weight, label, s=s, m=m, easy_margin=False, use_penalty=True,
        block_b=8, tile_c=128, matmul_dtype=jnp.float32,
        cosine_dtype=jnp.float32)
    jax.block_until_ready((out32, cos32))
    assert out32.shape == (B, C) and cos32.shape == (B, C)
    assert jnp.allclose(cos32, ref_cos, atol=2e-3, rtol=0)
    assert jnp.allclose(out32, ref_out, atol=6e-2, rtol=0)

    # --- default fast path: bf16 MXU operands (f32 accumulate), bf16 cosine
    #     output, auto block_b / tile_c (clipped for this tiny problem).
    out16, cos16 = arc_margin_product(
        x, weight, label, s=s, m=m, easy_margin=False, use_penalty=True)
    jax.block_until_ready((out16, cos16))
    assert out16.shape == (B, C) and cos16.shape == (B, C)
    assert jnp.allclose(cos16.astype(jnp.float32), ref_cos, atol=2e-2, rtol=0)
    assert jnp.allclose(out16, ref_out, atol=0.6, rtol=0)

    # --- no-penalty specialized path (label=None): single output s*cosine,
    #     no label input / margin math inside the kernel.
    logits = arc_margin_product(x, weight, None, s=s, m=m, use_penalty=False,
                                matmul_dtype=jnp.float32)
    jax.block_until_ready(logits)
    assert logits.shape == (B, C)
    assert jnp.allclose(logits, s * ref_cos, atol=6e-2, rtol=0)

    print("KERNEL_OK")
</pallas_src>

<mosaic_0001>
module attributes {stable_mosaic.version = 11 : i64} {
  func.func @_row_normalize_kernel(%arg0: i32, %arg1: memref<16x32xf32, #tpu.memory_space<vmem>>, %arg2: memref<16x32xf32, #tpu.memory_space<vmem>>) attributes {dimension_semantics = [#tpu.dimension_semantics<parallel>], iteration_bounds = array<i64: 1>, scalar_prefetch = 0 : i64, scratch_operands = 0 : i64, tpu.core_type = #tpu.core_type<tc>, window_params = [{transform_indices = @transform_0, window_bounds = array<i64: 16, 32>}, {transform_indices = @transform_1, window_bounds = array<i64: 16, 32>}]} {
    %c0 = arith.constant 0 : index
    %c0_0 = arith.constant 0 : index
    %0 = vector.load %arg1[%c0, %c0_0] : memref<16x32xf32, #tpu.memory_space<vmem>>, vector<16x32xf32>
    %1 = arith.mulf %0, %0 : vector<16x32xf32>
    %cst = arith.constant dense<0.000000e+00> : vector<16xf32>
    %2 = vector.multi_reduction <add>, %1, %cst [1] : vector<16x32xf32> to vector<16xf32>
    %3 = vector.shape_cast %2 : vector<16xf32> to vector<16x1xf32>
    %cst_1 = arith.constant 1.000000e-24 : f32
    %4 = vector.broadcast %cst_1 : f32 to vector<16x1xf32>
    %5 = arith.maximumf %3, %4 : vector<16x1xf32>
    %6 = math.rsqrt %5 : vector<16x1xf32>
    %7 = vector.broadcast %6 : vector<16x1xf32> to vector<16x32xf32>
    %8 = arith.mulf %0, %7 : vector<16x32xf32>
    %c0_2 = arith.constant 0 : index
    %c0_3 = arith.constant 0 : index
    %9 = vector.load %arg2[%c0_2, %c0_3] : memref<16x32xf32, #tpu.memory_space<vmem>>, vector<16x32xf32>
    tpu.vector_store %arg2[%c0_2, %c0_3], %8 {strides = array<i32>} : memref<16x32xf32, #tpu.memory_space<vmem>>, vector<16x32xf32>,
    return
  }
  func.func @transform_0(%arg0: i32) -> (i32, i32) {
    %c0_i32 = arith.constant 0 : i32
    %c0_i32_0 = arith.constant 0 : i32
    return %arg0, %c0_i32 : i32, i32
  }
  func.func @transform_1(%arg0: i32) -> (i32, i32) {
    %c0_i32 = arith.constant 0 : i32
    %c0_i32_0 = arith.constant 0 : i32
    return %arg0, %c0_i32 : i32, i32
  }
}

</mosaic_0001>

<bundles_post_ra>
// kernel: tpu_custom_call.1
= control target key start
LH: loop header
LB: loop body
LE: loop exit
PB: predicated region body
PF: predicated region fallthrough
CT: control target
= control target key end

     0   :  { %6 = vsyncpa [#allocation3], 0  ;;  %s171_s0 = inlined_call_operand.hbm [shape: f32[10,32], index: 0, kind: input, shape index: {}]   ;;  %s172_s1 = inlined_call_operand.hbm [shape: f32[10,32], index: 1, kind: output, shape index: {}]  }
   0x1   :  { %7 = vsyncpa [#allocation4], 0  ;;  %s12_s8 = sshll.u32 %s171_s0, 4  ;;  %s141_s9 = smov [#allocation2]   ;;  %s13_s8 = int_to_ptr.hbm [resolvable:$true] %s12_s8 }
   0x2   :  { %s14_s10 = sshll.u32 %s141_s9, 4  ;;  %s142_s11 = smov 128   ;;  %s15_s10 = int_to_ptr.vmem [resolvable:$true] %s14_s10 }
   0x3   :  { %s143_s12 = smov 8  }
   0x4   :  { %20 = dma.hbm_to_vmem [thread:$0]  %s13_s8, 256, %s15_s10, [#allocation3], %s142_s11, %s142_s11, %s143_s12  }
   0x5   :  { %137 = dma.done.wait [#allocation3], 256  }
   0x6   :  { %138 = vsyncadd [#allocation3], 4294967040  ;;  %v25_v0 = vld [vmem:[#allocation2] sm:$0xff]  ;;  %vm29_vm0 = vcmask 261120   ;;  %v26_v2 = vld [vmem:[#allocation2 + $0x8] sm:$0xff]  ;;  %s144_s0 = smov [#allocation5]  }
   0x7   :  { %v27_v1 = vmul.f32 %v25_v0, %v25_v0  ;;  %v28_v4 = vmul.f32 %v26_v2, %v26_v2  ;;  %s66_s13 = sshll.u32 %s144_s0, 4  ;;  %s68_s16 = sshll.u32 %s172_s1, 4  ;;  %s67_s13 = int_to_ptr.vmem [resolvable:$true] %s66_s13  ;;  %s69_s16 = int_to_ptr.hbm [resolvable:$true] %s68_s16 }
   0x9   :  { %v30_v3 = vsel %vm29_vm0, %v27_v1, 0.0  ;;  %v33_v5 = vsel %vm29_vm0, %v28_v4, 0.0 }
   0xa   :  { %31 = vadd.xlane.f32.xlu0 %v30_v3 }
  0x12   :  { %34 = vadd.xlane.f32.xlu0 %v33_v5 }
  0x7d   :  { %v32_v6 = vpop.xlane.xlu0 %31 }
  0x7e   :  { %v36_v7 = vmax.f32 %v32_v6, 1e-24 }
  0x80   :  { %85 = vrsqrt.f32 %v36_v7  ;;  %vm44_vm2 = vweird.f32 %v36_v7 }
  0x85   :  { %v35_v8 = vpop.xlane.xlu0 %34 }
  0x86   :  { %v86_v9 = vpop.eup %85  ;;  %v37_v10 = vmax.f32 %v35_v8, 1e-24 }
  0x87   :  { %v39_v11 = vmul.f32 %v86_v9, %v36_v7  ;;  %vm45_vm1 = vweird.f32 %v86_v9 }
  0x88   :  { %87 = vrsqrt.f32 %v37_v10  ;;  %vm46_vm3 = vmor %vm44_vm2, %vm45_vm1  ;;  %vm54_vm5 = vweird.f32 %v37_v10 }
  0x89   :  { %v40_v12 = vmul.f32 %v86_v9, %v39_v11 }
  0x8b   :  { %v41_v13 = vmul.f32 0.5, %v40_v12 }
  0x8d   :  { %v42_v14 = vsub.f32 1.5, %v41_v13 }
  0x8e   :  { %v88_v15 = vpop.eup %87 }
  0x8f   :  { %v43_v16 = vmul.f32 %v86_v9, %v42_v14  ;;  %v49_v17 = vmul.f32 %v88_v15, %v37_v10  ;;  %vm55_vm4 = vweird.f32 %v88_v15 }
  0x90   :  { %vm56_vm6 = vmor %vm54_vm5, %vm55_vm4 }
  0x91   :  { %v47_v18 = vsel %vm46_vm3, %v86_v9, %v43_v16  ;;  %v50_v19 = vmul.f32 %v88_v15, %v49_v17 }
  0x92   :  { %v58_v20 = vmul.f32 %v47_v18, %v25_v0 }
  0x93   :  { %v51_v21 = vmul.f32 0.5, %v50_v19 }
  0x94   :  { %60 = vst.msk [vmem:[#allocation5] sm:$0xff] %vm29_vm0, %v58_v20 }
  0x95   :  { %v52_v22 = vsub.f32 1.5, %v51_v21 }
  0x97   :  { %v53_v23 = vmul.f32 %v88_v15, %v52_v22 }
  0x99   :  { %v57_v24 = vsel %vm56_vm6, %v88_v15, %v53_v23 }
  0x9a   :  { %v59_v25 = vmul.f32 %v57_v24, %v26_v2 }
  0x9c   :  { %61 = vst.msk [vmem:[#allocation5 + $0x8] sm:$0xff] %vm29_vm0, %v59_v25 }
  0x9d   :  { %74 = dma.vmem_to_hbm [thread:$0]  %s67_s13, 256, %s69_s16, [#allocation4], %s142_s11, %s142_s11, %s143_s12  }
  0x9e   :  { %139 = dma.done.wait [#allocation4], 256  }
  0x9f   :  { %140 = vsyncadd [#allocation4], 4294967040 }
  0xa0   :  { %79 = vsyncpa [#allocation3], 1 }
  0xa1   :  { %80 = vsyncpa [#allocation4], 1 }

</bundles_post_ra>
